<compile_context>
chip_gen: v7x
topology: tpu7x:2x2x1
jax: 0.10.0
libtpu: 0.0.40
codegen_flags: <defaults>
</compile_context>

<pallas_src>
import functools

import numpy as np

import jax
import jax.numpy as jnp
from jax.experimental import pallas as pl
from jax.experimental.pallas import tpu as pltpu


# ------------------------------ helpers -------------------------------------

def _round_up(x, m):
    return (x + m - 1) // m * m


def _cdiv(a, b):
    return -(-a // b)


def _pad2d(x, rows, cols):
    r, c = x.shape
    if r == rows and c == cols:
        return x
    return jnp.pad(x, ((0, rows - r), (0, cols - c)))


def _tpu_vmem_bytes():
    try:
        return int(pltpu.get_tpu_info().vmem_capacity_bytes)
    except Exception:
        return 64 * 1024 * 1024          # conservative (v7x per-TC VMEM)


def _vmem_limit(need_bytes):
    cap = _tpu_vmem_bytes()
    return int(max(min(need_bytes + (8 << 20), cap - (8 << 20)), 16 << 20))


def _row_tiling(rows, max_tile):
    """Pick (tm, rows_p): tm a multiple of 16 (bf16 sublane tile), minimal padding."""
    rows16 = _round_up(max(rows, 16), 16)
    if rows16 <= max_tile:
        return rows16, rows16
    n_tiles = _cdiv(rows16, max_tile)
    tm = _round_up(_cdiv(rows16, n_tiles), 16)
    return tm, tm * n_tiles


# --------------------------- small MLP kernel --------------------------------

def _mlp_kernel(x_ref, w1_ref, b1_ref, w2_ref, b2_ref, o_ref):
    x = x_ref[...]                                                    # bf16 (tm, Din)
    h = jnp.dot(x, w1_ref[...], preferred_element_type=jnp.float32) + b1_ref[...]
    h = jnp.maximum(h, 0.0).astype(x.dtype)                           # ReLU -> bf16
    h2 = jnp.dot(h, w2_ref[...], preferred_element_type=jnp.float32) + b2_ref[...]
    o_ref[...] = h2.astype(o_ref.dtype)


def mlp_project(x, w1, b1, w2, b2, *, compute_dtype=jnp.bfloat16):
    """x: (rows, d_in) -> (rows, round_up(d_out, 128)) bf16 (padded cols are 0)."""
    rows, d_in = x.shape
    d_hid = w1.shape[1]
    d_out = w2.shape[1]

    d_in_p = _round_up(d_in, 128)
    d_hid_p = _round_up(d_hid, 128)
    d_out_p = _round_up(d_out, 128)
    tm, rows_p = _row_tiling(rows, 1024)

    x_p = _pad2d(x, rows_p, d_in_p).astype(compute_dtype)
    w1_p = _pad2d(w1, d_in_p, d_hid_p).astype(compute_dtype)
    b1_p = _pad2d(b1, 1, d_hid_p).astype(jnp.float32)
    w2_p = _pad2d(w2, d_hid_p, d_out_p).astype(compute_dtype)
    b2_p = _pad2d(b2, 1, d_out_p).astype(jnp.float32)

    grid = (rows_p // tm,)

    flops = 2 * rows_p * (d_in_p * d_hid_p + d_hid_p * d_out_p)
    bytes_accessed = (rows_p * d_in_p * 2 + int(w1_p.size) * 2 + int(w2_p.size) * 2
                      + int(b1_p.size) * 4 + int(b2_p.size) * 4
                      + rows_p * d_out_p * 2)
    vmem_need = (2 * tm * d_in_p * 2 + 2 * int(w1_p.size) * 2 + 2 * int(w2_p.size) * 2
                 + 2 * int(b1_p.size) * 4 + 2 * int(b2_p.size) * 4
                 + 2 * tm * d_out_p * 2)

    out = pl.pallas_call(
        _mlp_kernel,
        out_shape=jax.ShapeDtypeStruct((rows_p, d_out_p), compute_dtype),
        grid_spec=pltpu.PrefetchScalarGridSpec(
            num_scalar_prefetch=0,
            grid=grid,
            in_specs=[
                pl.BlockSpec((tm, d_in_p), lambda i: (i, 0)),       # x row tile
                pl.BlockSpec((d_in_p, d_hid_p), lambda i: (0, 0)),  # W1 (resident)
                pl.BlockSpec((1, d_hid_p), lambda i: (0, 0)),       # b1
                pl.BlockSpec((d_hid_p, d_out_p), lambda i: (0, 0)),  # W2 (resident)
                pl.BlockSpec((1, d_out_p), lambda i: (0, 0)),       # b2
            ],
            out_specs=pl.BlockSpec((tm, d_out_p), lambda i: (i, 0)),
        ),
        compiler_params=pltpu.CompilerParams(
            dimension_semantics=("parallel",),
            vmem_limit_bytes=_vmem_limit(vmem_need),
        ),
        cost_estimate=pl.CostEstimate(flops=flops, transcendentals=0,
                                      bytes_accessed=bytes_accessed),
    )(x_p, w1_p, b1_p, w2_p, b2_p)

    return out[:rows, :]


# ----------------------- prompt_proj2 (big matmul) kernel ---------------------

def _prompt_matmul_kernel(a_ref, pw_ref, pb_ref, o_ref):
    acc = jnp.dot(a_ref[...], pw_ref[...], preferred_element_type=jnp.float32)
    o_ref[...] = (acc + pb_ref[...]).astype(o_ref.dtype)


def prompt_project(act, pw_slabs, pb_slabs, *, out_dtype=jnp.bfloat16):
    """act: (rows, h_p) bf16; pw_slabs: (S, h_p, h_p) bf16; pb_slabs: (S, 1, h_p) f32
       -> (S, rows, h_p): one contiguous slab per (layer, block)."""
    rows, h_p = act.shape
    S = pw_slabs.shape[0]
    out_bytes = np.dtype(out_dtype).itemsize

    # Generation-aware row tile: big enough that PW streams only 1-2x total,
    # small enough that double-buffered tiles fit VMEM (64 MiB on v7x).
    cap = _tpu_vmem_bytes()
    max_tile = 4096 if cap >= (96 << 20) else 2048
    while max_tile > 256:
        need = (2 * max_tile * h_p * 2 + 2 * h_p * h_p * 2
                + 2 * h_p * 4 + 2 * max_tile * h_p * out_bytes)
        if need <= cap - (16 << 20):
            break
        max_tile //= 2
    tm, rows_p = _row_tiling(rows, max_tile)

    act_p = _pad2d(act, rows_p, h_p)
    n_row_tiles = rows_p // tm
    grid = (n_row_tiles, S)

    flops = 2 * rows_p * h_p * h_p * S
    bytes_accessed = (rows_p * h_p * 2                     # act (fetched once per row tile)
                      + n_row_tiles * S * h_p * h_p * 2    # PW streamed per row tile
                      + n_row_tiles * S * h_p * 4          # bias
                      + S * rows_p * h_p * out_bytes)      # output writeback
    vmem_need = (2 * tm * h_p * 2 + 2 * h_p * h_p * 2
                 + 2 * h_p * 4 + 2 * tm * h_p * out_bytes)

    out = pl.pallas_call(
        _prompt_matmul_kernel,
        out_shape=jax.ShapeDtypeStruct((S, rows_p, h_p), out_dtype),
        grid_spec=pltpu.PrefetchScalarGridSpec(
            num_scalar_prefetch=0,
            grid=grid,
            in_specs=[
                # Activation row tile: index_map constant in j, so the tile is
                # fetched once and reused across all S weight slabs.
                pl.BlockSpec((tm, h_p), lambda i, j: (i, 0)),
                # One contiguous (h_p, h_p) weight slab per (layer, block).
                pl.BlockSpec((None, h_p, h_p), lambda i, j: (j, 0, 0)),
                pl.BlockSpec((None, 1, h_p), lambda i, j: (j, 0, 0)),
            ],
            out_specs=pl.BlockSpec((None, tm, h_p), lambda i, j: (j, i, 0)),
        ),
        compiler_params=pltpu.CompilerParams(
            # No state carried across grid steps -> both axes megacore-shardable.
            dimension_semantics=("parallel", "parallel"),
            vmem_limit_bytes=_vmem_limit(vmem_need),
        ),
        cost_estimate=pl.CostEstimate(flops=flops, transcendentals=0,
                                      bytes_accessed=bytes_accessed),
    )(act_p, pw_slabs, pb_slabs)

    return out[:, :rows, :]


# ------------------------------ Projector -----------------------------------

def init_linear(key, d_in, d_out, scale=0.02):
    kw, kb = jax.random.split(key)
    w = scale * jax.random.normal(kw, (d_in, d_out), dtype=jnp.float32)
    b = scale * jax.random.normal(kb, (1, d_out), dtype=jnp.float32)
    return w, b


def init_projector_params(key, gpt_hidden, bert_hidden, entity_dim, n_layer, n_block):
    half = gpt_hidden // 2
    keys = jax.random.split(key, 7)
    return {
        "token_proj": (init_linear(keys[0], bert_hidden, half),
                       init_linear(keys[1], half, gpt_hidden)),
        "entity_proj": (init_linear(keys[2], entity_dim, half),
                        init_linear(keys[3], half, gpt_hidden)),
        "user_proj": (init_linear(keys[4], entity_dim, half),
                      init_linear(keys[5], half, gpt_hidden)),
        "prompt_proj2": init_linear(keys[6], gpt_hidden,
                                    n_layer * n_block * gpt_hidden),
    }


@functools.partial(jax.jit, static_argnames=("projection_order", "n_layer",
                                             "n_block", "n_head"))
def projector_forward(params, token_emb, token_mask, entity_emb, entity_mask,
                      user_representation, *, projection_order, n_layer,
                      n_block, n_head):
    B, T_tok, bert_h = token_emb.shape
    _, T_ent, ent_d = entity_emb.shape

    pw, pb = params["prompt_proj2"]
    H = pw.shape[0]                       # gpt_hidden
    S = n_layer * n_block
    head_dim = H // n_head
    h_p = _round_up(H, 128)

    def mlp(x2d, p):
        (w1, b1), (w2, b2) = p
        return mlp_project(x2d, w1, b1, w2, b2)   # (rows, h_p) bf16, padded cols = 0

    ones = jnp.ones((B, 1), dtype=token_mask.dtype)
    pieces, masks = [], []

    if projection_order in (1, 2, 3):
        tok = mlp(token_emb.reshape(B * T_tok, bert_h),
                  params["token_proj"]).reshape(B, T_tok, h_p)
        pieces.append(tok)
        masks.append(token_mask)
    if projection_order in (2, 3):
        ent = mlp(entity_emb.reshape(B * T_ent, ent_d),
                  params["entity_proj"]).reshape(B, T_ent, h_p)
        pieces.append(ent)
        masks.append(entity_mask)
    if projection_order in (3, 4):
        usr = mlp(user_representation, params["user_proj"]).reshape(B, 1, h_p)
        pieces.append(usr)
        masks.append(ones)
    if not pieces:
        raise ValueError("projection_order must be in {1, 2, 3, 4}")

    # Small (B, P, h_p) bf16 activation -> cheap XLA concat (a few MB at most).
    enc = pieces[0] if len(pieces) == 1 else jnp.concatenate(pieces, axis=1)
    encoder_mask = masks[0] if len(masks) == 1 else jnp.concatenate(masks, axis=1)
    P = enc.shape[1]

    # Lay out prompt_proj2 as one contiguous (H, H) slab per (layer, block):
    # contiguous column-tile DMAs in the kernel + contiguous output slabs.
    # TODO(synk): store prompt_proj2 pre-transposed as (S, H, H) in the params.
    pw_slabs = jnp.pad(pw.reshape(H, S, H).transpose(1, 0, 2),
                       ((0, 0), (0, h_p - H), (0, h_p - H))).astype(jnp.bfloat16)
    pb_slabs = jnp.pad(pb.reshape(S, 1, H),
                       ((0, 0), (0, 0), (0, h_p - H))).astype(jnp.float32)

    out = prompt_project(enc.reshape(B * P, h_p), pw_slabs, pb_slabs)  # (S, B*P, h_p)
    out = out[:, :, :H].reshape(n_layer, n_block, B, P, n_head, head_dim)
    # Original permute(2,3,0,4,1,5) collapses to a cheap (P, n_head) swap
    # because each (layer, block) slab already lands contiguously.
    prompt_embeds = jnp.transpose(out, (0, 1, 2, 4, 3, 5))
    return prompt_embeds, encoder_mask


# ------------------------------- Reference ----------------------------------

def _ref_forward(params, token_emb, token_mask, entity_emb, entity_mask,
                 user_representation, projection_order, n_layer, n_block,
                 n_head, compute_dtype=jnp.bfloat16):
    cd = compute_dtype

    def mlp(x, p):
        (w1, b1), (w2, b2) = p
        h = jnp.dot(x.astype(cd), w1.astype(cd),
                    preferred_element_type=jnp.float32) + b1
        h = jnp.maximum(h, 0.0).astype(cd)
        h2 = jnp.dot(h, w2.astype(cd),
                     preferred_element_type=jnp.float32) + b2
        return h2.astype(cd)

    t = mlp(token_emb, params["token_proj"])
    e = mlp(entity_emb, params["entity_proj"])
    u = mlp(user_representation, params["user_proj"])
    B = token_emb.shape[0]
    ones = jnp.ones((B, 1), dtype=token_mask.dtype)
    if projection_order == 1:
        state, mask = t, token_mask
    elif projection_order == 2:
        state = jnp.concatenate([t, e], axis=1)
        mask = jnp.concatenate([token_mask, entity_mask], axis=1)
    elif projection_order == 3:
        state = jnp.concatenate([t, e, u[:, None, :]], axis=1)
        mask = jnp.concatenate([token_mask, entity_mask, ones], axis=1)
    else:
        state, mask = u[:, None, :], ones

    pw, pb = params["prompt_proj2"]
    H = pw.shape[0]
    P = state.shape[1]
    out = jnp.dot(state.astype(cd), pw.astype(cd),
                  preferred_element_type=jnp.float32) + pb
    out = out.astype(cd)
    out = out.reshape(B, P, n_layer, n_block, n_head, H // n_head)
    return jnp.transpose(out, (2, 3, 0, 4, 1, 5)), mask


# --------------------------------- Main --------------------------------------

if __name__ == "__main__":
    B = 2
    T_TOK = 8
    T_ENT = 4
    GPT_HIDDEN = 32      # gpt2_config.hidden_size
    BERT_HIDDEN = 48
    ENTITY_DIM = 24
    N_LAYER = 2          # gpt2_config.n_layer
    N_BLOCK = 2
    N_HEAD = 4           # gpt2_config.n_head
    PROJECTION_ORDER = 3

    key = jax.random.PRNGKey(0)
    k_params, k_tok, k_ent, k_usr, k_tm, k_em = jax.random.split(key, 6)

    params = init_projector_params(k_params, GPT_HIDDEN, BERT_HIDDEN,
                                   ENTITY_DIM, N_LAYER, N_BLOCK)

    token_emb = jax.random.normal(k_tok, (B, T_TOK, BERT_HIDDEN), jnp.float32)
    entity_emb = jax.random.normal(k_ent, (B, T_ENT, ENTITY_DIM), jnp.float32)
    user_repr = jax.random.normal(k_usr, (B, ENTITY_DIM), jnp.float32)
    token_mask = (jax.random.uniform(k_tm, (B, T_TOK)) > 0.2).astype(jnp.float32)
    entity_mask = (jax.random.uniform(k_em, (B, T_ENT)) > 0.2).astype(jnp.float32)

    prompt_embeds, encoder_mask = projector_forward(
        params, token_emb, token_mask, entity_emb, entity_mask, user_repr,
        projection_order=PROJECTION_ORDER, n_layer=N_LAYER,
        n_block=N_BLOCK, n_head=N_HEAD)
    prompt_embeds = jax.block_until_ready(prompt_embeds)
    encoder_mask = jax.block_until_ready(encoder_mask)

    # Shape check: (n_layer, n_block, B, n_head, P, head_dim)
    P = T_TOK + T_ENT + 1
    assert prompt_embeds.shape == (N_LAYER, N_BLOCK, B, N_HEAD, P,
                                   GPT_HIDDEN // N_HEAD), prompt_embeds.shape
    assert encoder_mask.shape == (B, P), encoder_mask.shape

    # Numerical check against a pure-JAX reference using the same bf16
    # matmul inputs / f32 accumulation / bf16 output precision path.
    ref_pe, ref_mask = _ref_forward(params, token_emb, token_mask, entity_emb,
                                    entity_mask, user_repr, PROJECTION_ORDER,
                                    N_LAYER, N_BLOCK, N_HEAD)
    pe_f32 = prompt_embeds.astype(jnp.float32)
    ref_f32 = ref_pe.astype(jnp.float32)
    assert jnp.allclose(pe_f32, ref_f32, atol=5e-3, rtol=5e-2), (
        float(jnp.max(jnp.abs(pe_f32 - ref_f32))))
    assert jnp.allclose(encoder_mask, ref_mask)

    print("KERNEL_OK")
</pallas_src>

<mosaic_0001>
module attributes {stable_mosaic.version = 11 : i64} {
  func.func @_mlp_kernel(%arg0: i32, %arg1: memref<16x128xbf16, #tpu.memory_space<vmem>>, %arg2: memref<128x128xbf16, #tpu.memory_space<vmem>>, %arg3: memref<1x128xf32, #tpu.memory_space<vmem>>, %arg4: memref<128x128xbf16, #tpu.memory_space<vmem>>, %arg5: memref<1x128xf32, #tpu.memory_space<vmem>>, %arg6: memref<16x128xbf16, #tpu.memory_space<vmem>>) attributes {dimension_semantics = [#tpu.dimension_semantics<parallel>], iteration_bounds = array<i64: 1>, scalar_prefetch = 0 : i64, scratch_operands = 0 : i64, tpu.core_type = #tpu.core_type<tc>, window_params = [{transform_indices = @transform_0, window_bounds = array<i64: 16, 128>}, {pipeline_mode = #tpu.pipeline_mode<synchronous>, transform_indices = @transform_1, window_bounds = array<i64: 128, 128>}, {pipeline_mode = #tpu.pipeline_mode<synchronous>, transform_indices = @transform_2, window_bounds = array<i64: 1, 128>}, {pipeline_mode = #tpu.pipeline_mode<synchronous>, transform_indices = @transform_3, window_bounds = array<i64: 128, 128>}, {pipeline_mode = #tpu.pipeline_mode<synchronous>, transform_indices = @transform_4, window_bounds = array<i64: 1, 128>}, {transform_indices = @transform_5, window_bounds = array<i64: 16, 128>}]} {
    %c0 = arith.constant 0 : index
    %c0_0 = arith.constant 0 : index
    %0 = vector.load %arg1[%c0, %c0_0] : memref<16x128xbf16, #tpu.memory_space<vmem>>, vector<16x128xbf16>
    %c0_1 = arith.constant 0 : index
    %c0_2 = arith.constant 0 : index
    %1 = vector.load %arg2[%c0_1, %c0_2] : memref<128x128xbf16, #tpu.memory_space<vmem>>, vector<128x128xbf16>
    %cst = arith.constant dense<0.000000e+00> : vector<16x128xf32>
    %2 = tpu.matmul %0, %1, %cst {dimension_numbers = #tpu.dot_dimension_numbers<[1], [0], [0], [1], [0, 0, 1, 1], [], []>} : vector<16x128xbf16>, vector<128x128xbf16>, vector<16x128xf32> -> vector<16x128xf32>
    %c0_3 = arith.constant 0 : index
    %c0_4 = arith.constant 0 : index
    %3 = vector.load %arg3[%c0_3, %c0_4] : memref<1x128xf32, #tpu.memory_space<vmem>>, vector<1x128xf32>
    %4 = vector.broadcast %3 : vector<1x128xf32> to vector<16x128xf32>
    %5 = arith.addf %2, %4 : vector<16x128xf32>
    %cst_5 = arith.constant 0.000000e+00 : f32
    %6 = vector.broadcast %cst_5 : f32 to vector<16x128xf32>
    %7 = arith.maximumf %5, %6 : vector<16x128xf32>
    %8 = arith.truncf %7 : vector<16x128xf32> to vector<16x128xbf16>
    %c0_6 = arith.constant 0 : index
    %c0_7 = arith.constant 0 : index
    %9 = vector.load %arg4[%c0_6, %c0_7] : memref<128x128xbf16, #tpu.memory_space<vmem>>, vector<128x128xbf16>
    %cst_8 = arith.constant dense<0.000000e+00> : vector<16x128xf32>
    %10 = tpu.matmul %8, %9, %cst_8 {dimension_numbers = #tpu.dot_dimension_numbers<[1], [0], [0], [1], [0, 0, 1, 1], [], []>} : vector<16x128xbf16>, vector<128x128xbf16>, vector<16x128xf32> -> vector<16x128xf32>
    %c0_9 = arith.constant 0 : index
    %c0_10 = arith.constant 0 : index
    %11 = vector.load %arg5[%c0_9, %c0_10] : memref<1x128xf32, #tpu.memory_space<vmem>>, vector<1x128xf32>
    %12 = vector.broadcast %11 : vector<1x128xf32> to vector<16x128xf32>
    %13 = arith.addf %10, %12 : vector<16x128xf32>
    %14 = arith.truncf %13 : vector<16x128xf32> to vector<16x128xbf16>
    %c0_11 = arith.constant 0 : index
    %c0_12 = arith.constant 0 : index
    %15 = vector.load %arg6[%c0_11, %c0_12] : memref<16x128xbf16, #tpu.memory_space<vmem>>, vector<16x128xbf16>
    tpu.vector_store %arg6[%c0_11, %c0_12], %14 {strides = array<i32>} : memref<16x128xbf16, #tpu.memory_space<vmem>>, vector<16x128xbf16>,
    return
  }
  func.func @transform_0(%arg0: i32) -> (i32, i32) {
    %c0_i32 = arith.constant 0 : i32
    %c0_i32_0 = arith.constant 0 : i32
    return %arg0, %c0_i32 : i32, i32
  }
  func.func @transform_1(%arg0: i32) -> (i32, i32) {
    %c0_i32 = arith.constant 0 : i32
    %c0_i32_0 = arith.constant 0 : i32
    %c0_i32_1 = arith.constant 0 : i32
    return %c0_i32, %c0_i32_0 : i32, i32
  }
  func.func @transform_2(%arg0: i32) -> (i32, i32) {
    %c0_i32 = arith.constant 0 : i32
    %c0_i32_0 = arith.constant 0 : i32
    %c0_i32_1 = arith.constant 0 : i32
    return %c0_i32, %c0_i32_0 : i32, i32
  }
  func.func @transform_3(%arg0: i32) -> (i32, i32) {
    %c0_i32 = arith.constant 0 : i32
    %c0_i32_0 = arith.constant 0 : i32
    %c0_i32_1 = arith.constant 0 : i32
    return %c0_i32, %c0_i32_0 : i32, i32
  }
  func.func @transform_4(%arg0: i32) -> (i32, i32) {
    %c0_i32 = arith.constant 0 : i32
    %c0_i32_0 = arith.constant 0 : i32
    %c0_i32_1 = arith.constant 0 : i32
    return %c0_i32, %c0_i32_0 : i32, i32
  }
  func.func @transform_5(%arg0: i32) -> (i32, i32) {
    %c0_i32 = arith.constant 0 : i32
    %c0_i32_0 = arith.constant 0 : i32
    return %arg0, %c0_i32 : i32, i32
  }
}

module attributes {stable_mosaic.version = 11 : i64} {
  func.func @_prompt_matmul_kernel(%arg0: i32, %arg1: i32, %arg2: memref<32x128xbf16, #tpu.memory_space<vmem>>, %arg3: memref<1x128x128xbf16, #tpu.memory_space<vmem>>, %arg4: memref<1x1x128xf32, #tpu.memory_space<vmem>>, %arg5: memref<1x32x128xbf16, #tpu.memory_space<vmem>>) attributes {dimension_semantics = [#tpu.dimension_semantics<parallel>, #tpu.dimension_semantics<parallel>], iteration_bounds = array<i64: 1, 4>, scalar_prefetch = 0 : i64, scratch_operands = 0 : i64, tpu.core_type = #tpu.core_type<tc>, window_params = [{transform_indices = @transform_0, window_bounds = array<i64: 32, 128>}, {transform_indices = @transform_1, window_bounds = array<i64: 1, 128, 128>}, {transform_indices = @transform_2, window_bounds = array<i64: 1, 1, 128>}, {transform_indices = @transform_3, window_bounds = array<i64: 1, 32, 128>}]} {
    %c0 = arith.constant 0 : index
    %c0_0 = arith.constant 0 : index
    %0 = vector.load %arg2[%c0, %c0_0] : memref<32x128xbf16, #tpu.memory_space<vmem>>, vector<32x128xbf16>
    %c0_1 = arith.constant 0 : index
    %c0_2 = arith.constant 0 : index
    %c0_3 = arith.constant 0 : index
    %1 = vector.load %arg3[%c0_1, %c0_2, %c0_3] : memref<1x128x128xbf16, #tpu.memory_space<vmem>>, vector<1x128x128xbf16>
    %2 = vector.shape_cast %1 : vector<1x128x128xbf16> to vector<128x128xbf16>
    %cst = arith.constant dense<0.000000e+00> : vector<32x128xf32>
    %3 = tpu.matmul %0, %2, %cst {dimension_numbers = #tpu.dot_dimension_numbers<[1], [0], [0], [1], [0, 0, 1, 1], [], []>} : vector<32x128xbf16>, vector<128x128xbf16>, vector<32x128xf32> -> vector<32x128xf32>
    %c0_4 = arith.constant 0 : index
    %c0_5 = arith.constant 0 : index
    %c0_6 = arith.constant 0 : index
    %4 = vector.load %arg4[%c0_4, %c0_5, %c0_6] : memref<1x1x128xf32, #tpu.memory_space<vmem>>, vector<1x1x128xf32>
    %5 = vector.shape_cast %4 : vector<1x1x128xf32> to vector<1x128xf32>
    %6 = vector.broadcast %5 : vector<1x128xf32> to vector<32x128xf32>
    %7 = arith.addf %3, %6 : vector<32x128xf32>
    %8 = arith.truncf %7 : vector<32x128xf32> to vector<32x128xbf16>
    %c0_7 = arith.constant 0 : index
    %c0_8 = arith.constant 0 : index
    %c0_9 = arith.constant 0 : index
    %9 = vector.load %arg5[%c0_7, %c0_8, %c0_9] : memref<1x32x128xbf16, #tpu.memory_space<vmem>>, vector<1x32x128xbf16>
    %10 = vector.shape_cast %9 : vector<1x32x128xbf16> to vector<32x128xbf16>
    %11 = vector.shape_cast %8 : vector<32x128xbf16> to vector<1x32x128xbf16>
    tpu.vector_store %arg5[%c0_7, %c0_8, %c0_9], %11 {strides = array<i32>} : memref<1x32x128xbf16, #tpu.memory_space<vmem>>, vector<1x32x128xbf16>,
    return
  }
  func.func @transform_0(%arg0: i32, %arg1: i32) -> (i32, i32) {
    %c0_i32 = arith.constant 0 : i32
    %c0_i32_0 = arith.constant 0 : i32
    return %arg0, %c0_i32 : i32, i32
  }
  func.func @transform_1(%arg0: i32, %arg1: i32) -> (i32, i32, i32) {
    %c0_i32 = arith.constant 0 : i32
    %c0_i32_0 = arith.constant 0 : i32
    %c0_i32_1 = arith.constant 0 : i32
    return %arg1, %c0_i32, %c0_i32_0 : i32, i32, i32
  }
  func.func @transform_2(%arg0: i32, %arg1: i32) -> (i32, i32, i32) {
    %c0_i32 = arith.constant 0 : i32
    %c0_i32_0 = arith.constant 0 : i32
    %c0_i32_1 = arith.constant 0 : i32
    return %arg1, %c0_i32, %c0_i32_0 : i32, i32, i32
  }
  func.func @transform_3(%arg0: i32, %arg1: i32) -> (i32, i32, i32) {
    %c0_i32 = arith.constant 0 : i32
    %c0_i32_0 = arith.constant 0 : i32
    return %arg1, %arg0, %c0_i32 : i32, i32, i32
  }
}

</mosaic_0001>

<bundles_post_ra>
// kernel: projector_forward.4
= control target key start
LH: loop header
LB: loop body
LE: loop exit
PB: predicated region body
PF: predicated region fallthrough
CT: control target
= control target key end

     0   :  { %v375_v0 = vmov 0.0   ;;  %vm376_vm0 = vmmov 0   ;;  %s467_s1 = inlined_call_operand.vmem [shape: bf16[128,128], index: 1, kind: input, shape index: {}]   ;;  %s468_s3 = inlined_call_operand.vmem [shape: bf16[128,128], index: 3, kind: input, shape index: {}]   ;;  %s469_s0 = inlined_call_operand.vmem [shape: bf16[16,128], index: 0, kind: input, shape index: {}]   ;;  %s470_s2 = inlined_call_operand.vmem [shape: f32[1,128], index: 2, kind: input, shape index: {}]   ;;  %s471_s4 = inlined_call_operand.vmem [shape: f32[1,128], index: 4, kind: input, shape index: {}]   ;;  %s472_s5 = inlined_call_operand.vmem [shape: bf16[16,128], index: 5, kind: output, shape index: {}]  }
   0x1   :  { %316 = vmatprep.subr.bf16.mxu0 %v375_v0  ;;  %v358_v1 = vld [vmem:[%s467_s1] sm:$0xff]   ;;  %332 = vmatprep.mubr.msk.bf16.mxu0 %vm376_vm0, %v375_v0  ;;  %v359_v2 = vld [vmem:[%s467_s1 + $0x8] sm:$0xff]   ;;  %v360_v3 = vld [vmem:[%s467_s1 + $0x10] sm:$0xff]  }
   0x2   :  { %336 = vmatprep.subr.bf16.mxu1 %v375_v0  ;;  %352 = vmatprep.mubr.msk.bf16.mxu1 %vm376_vm0, %v375_v0  ;;  %v367_v4 = vld [vmem:[%s468_s3] sm:$0xff]   ;;  %v361_v5 = vld [vmem:[%s467_s1 + $0x18] sm:$0xff]   ;;  %v368_v6 = vld [vmem:[%s468_s3 + $0x8] sm:$0xff]  }
   0x3   :  { %317 = vmatpush3.bf16.msra.mxu0 %v358_v1  ;;  %337 = vmatpush3.bf16.msra.mxu1 %v367_v4  ;;  %v362_v7 = vld [vmem:[%s467_s1 + $0x20] sm:$0xff]   ;;  %v369_v8 = vld [vmem:[%s468_s3 + $0x10] sm:$0xff]   ;;  %v363_v9 = vld [vmem:[%s467_s1 + $0x28] sm:$0xff]  }
   0x4   :  { %318 = vmatprep.subr.bf16.mxu0 %v375_v0  ;;  %338 = vmatprep.subr.bf16.mxu1 %v375_v0  ;;  %v370_v10 = vld [vmem:[%s468_s3 + $0x18] sm:$0xff]   ;;  %v364_v11 = vld [vmem:[%s467_s1 + $0x30] sm:$0xff]   ;;  %v371_v12 = vld [vmem:[%s468_s3 + $0x20] sm:$0xff]  }
   0x5   :  { %v365_v13 = vld [vmem:[%s467_s1 + $0x38] sm:$0xff]   ;;  %v372_v14 = vld [vmem:[%s468_s3 + $0x28] sm:$0xff]   ;;  %v366_v15 = vld [vmem:[%s469_s0] sm:$0xff]  }
   0x6   :  { %v373_v16 = vld [vmem:[%s468_s3 + $0x30] sm:$0xff]   ;;  %v374_v17 = vld [vmem:[%s468_s3 + $0x38] sm:$0xff]   ;;  %v270_v18 = vld [vmem:[%s470_s2] ss:$0 sm:$0xff] }
   0x7   :  { %319 = vmatpush3.bf16.msra.mxu0 %v359_v2  ;;  %339 = vmatpush3.bf16.msra.mxu1 %v368_v6  ;;  %v280_v28 = vld [vmem:[%s471_s4] ss:$0 sm:$0xff] }
   0x8   :  { %320 = vmatprep.subr.bf16.mxu0 %v375_v0  ;;  %340 = vmatprep.subr.bf16.mxu1 %v375_v0 }
   0xb   :  { %321 = vmatpush3.bf16.msra.mxu0 %v360_v3  ;;  %341 = vmatpush3.bf16.msra.mxu1 %v369_v8 }
   0xc   :  { %322 = vmatprep.subr.bf16.mxu0 %v375_v0  ;;  %342 = vmatprep.subr.bf16.mxu1 %v375_v0 }
   0xf   :  { %323 = vmatpush3.bf16.msra.mxu0 %v361_v5  ;;  %343 = vmatpush3.bf16.msra.mxu1 %v370_v10 }
  0x10   :  { %324 = vmatprep.subr.bf16.mxu0 %v375_v0  ;;  %344 = vmatprep.subr.bf16.mxu1 %v375_v0 }
  0x13   :  { %325 = vmatpush3.bf16.msra.mxu0 %v362_v7  ;;  %345 = vmatpush3.bf16.msra.mxu1 %v371_v12 }
  0x14   :  { %326 = vmatprep.subr.bf16.mxu0 %v375_v0  ;;  %346 = vmatprep.subr.bf16.mxu1 %v375_v0 }
  0x17   :  { %327 = vmatpush3.bf16.msra.mxu0 %v363_v9  ;;  %347 = vmatpush3.bf16.msra.mxu1 %v372_v14 }
  0x18   :  { %328 = vmatprep.subr.bf16.mxu0 %v375_v0  ;;  %348 = vmatprep.subr.bf16.mxu1 %v375_v0 }
  0x1b   :  { %329 = vmatpush3.bf16.msra.mxu0 %v364_v11  ;;  %349 = vmatpush3.bf16.msra.mxu1 %v373_v16 }
  0x1c   :  { %330 = vmatprep.subr.bf16.mxu0 %v375_v0  ;;  %350 = vmatprep.subr.bf16.mxu1 %v375_v0 }
  0x1f   :  { %331 = vmatpush3.bf16.msra.mxu0 %v365_v13  ;;  %351 = vmatpush3.bf16.msra.mxu1 %v374_v17 }
  0x22   :  { %333 = vmatmul.mubr.bf16.vlgmr.msra.gmra.mrb[0].mxu0 %v366_v15 }
  0xf5   :  { %v134_v19 = vpop.f32.mrb[0].mxu0 }
  0xf6   :  { %v135_v20 = vadd.f32 %v270_v18, %v134_v19  ;;  %v334_v21 = vpop.f32.mrb[1].mxu0 }
  0xf7   :  { %v137_v22 = vpop.f32.mrb[2].mxu0 }
  0xf8   :  { %v138_v23 = vadd.f32 %v270_v18, %v137_v22  ;;  %v335_v24 = vpop.f32.mrb[3].mxu0  ;;  %v141_v25 = vmax.f32 %v135_v20, 0.0 }
  0xfa   :  { %v142_v26 = vmax.f32 %v138_v23, 0.0 }
  0xfc   :  { %v143_v27 = vpack.c.bf16 %v142_v26, %v141_v25 }
  0xfe   :  { %353 = vmatmul.mubr.bf16.vlgmr.msra.gmra.mrb[0].mxu1 %v143_v27 }
 0x1d1   :  { %v249_v29 = vpop.f32.mrb[0].mxu1 }
 0x1d2   :  { %v354_v30 = vpop.f32.mrb[1].mxu1  ;;  %v250_v32 = vadd.f32 %v280_v28, %v249_v29 }
 0x1d3   :  { %v252_v31 = vpop.f32.mrb[2].mxu1 }
 0x1d4   :  { %v253_v33 = vadd.f32 %v280_v28, %v252_v31  ;;  %v355_v34 = vpop.f32.mrb[3].mxu1 }
 0x1d6   :  { %v296_v35 = vpack.c.bf16 %v253_v33, %v250_v32 }
 0x1d8   :  { %297 = vst [vmem:[%s472_s5] sm:$0xff] %v296_v35  }

// kernel: projector_forward.7
= control target key start
LH: loop header
LB: loop body
LE: loop exit
PB: predicated region body
PF: predicated region fallthrough
CT: control target
= control target key end

     0   :  { %s644_s12 = smov 0   ;;  %s646_s13 = smov 0   ;;  %s691_s0 = inlined_call_operand.vmem [shape: bf16[32,128], index: 0, kind: input, shape index: {}]   ;;  %s692_s1 = inlined_call_operand.vmem [shape: bf16[4,128,128], index: 1, kind: input, shape index: {}]   ;;  %s693_s2 = inlined_call_operand.vmem [shape: f32[4,1,128], index: 2, kind: input, shape index: {}]   ;;  %s694_s3 = inlined_call_operand.vmem [shape: bf16[4,32,128], index: 3, kind: output, shape index: {}]  }
   0x1   :  { %s648_s14 = smov 0  }
   0x2 LB: > { %s22_s15 = sadd.s32 1, %s618_s13  ;;  %p497_p0 = scmp.ge.s32.totalorder %s622_s14, 1  ;;  %s622_s14 = sphi %s648_s14, %s13_s14   ;;  %s618_s13 = sphi %s646_s13, %s696_s13   ;;  %s614_s12 = sphi %s644_s12, %s695_s12  }
   0x3   : > { %p23_p1 = scmp.ge.s32.totalorder %s22_s15, 4  ;;  %p170_p2 = scmp.lt.s32.totalorder %s622_s14, 5 }
   0x5   : > { %s698_s15 = smov (%p23_p1, %s22_s15), 0  ;;  %p171_p3 = pnand %p497_p0, %p170_p2 }
   0x6   : > { %p212_p4 = scmp.lt.s32.totalorder (!%p171_p3), %s614_s12, 3  ;;  %v598_v0 = vld [vmem:[%s691_s0] sm:$0xff] (!%p171_p3)   ;;  %v599_v9 = vld [vmem:[%s691_s0 + $0x8] sm:$0xff] (!%p171_p3)  }
   0x7   : > { %174 = sbr.rel (%p171_p3) target bundleno = 270 (0x10e), region = 32  ;;  %562 = vmatprep.mubr.bf16.mxu0 (!%p171_p3), %v598_v0 }
   0xe   : > { %s700_s12 = smov (!%p212_p4, %s614_s12), 3 }
   0xf   : > { %s519_s18 = sshll.u32 %s700_s12, 6  ;;  %s219_s26 = scalar_lea.vmem %s693_s2, %s700_s12 }
  0x10   : > { %s216_s21 = scalar_lea.vmem %s692_s1, %s519_s18  ;;  %v502_v11 = vld [vmem:[%s219_s26] ss:$0 sm:$0xff]  ;;  %s520_s27 = sshll.u32 %s700_s12, 4 }
  0x11   : > { %v590_v1 = vld [vmem:[%s216_s21] sm:$0xff]   ;;  %v591_v2 = vld [vmem:[%s216_s21 + $0x8] sm:$0xff]   ;;  %v592_v3 = vld [vmem:[%s216_s21 + $0x10] sm:$0xff]   ;;  %s228_s30 = scalar_lea.vmem %s694_s3, %s520_s27 }
  0x12   : > { %546 = vmatprep.subr.bf16.mxu0 %v590_v1  ;;  %v593_v4 = vld [vmem:[%s216_s21 + $0x18] sm:$0xff]   ;;  %v594_v5 = vld [vmem:[%s216_s21 + $0x20] sm:$0xff]   ;;  %v595_v6 = vld [vmem:[%s216_s21 + $0x28] sm:$0xff]  }
  0x13   : > { %547 = vmatpush3.bf16.msra.mxu0 %v590_v1  ;;  %v596_v7 = vld [vmem:[%s216_s21 + $0x30] sm:$0xff]   ;;  %v597_v8 = vld [vmem:[%s216_s21 + $0x38] sm:$0xff]  }
  0x14   : > { %548 = vmatprep.subr.bf16.mxu0 %v591_v2 }
  0x17   : > { %549 = vmatpush3.bf16.msra.mxu0 %v591_v2 }
  0x18   : > { %550 = vmatprep.subr.bf16.mxu0 %v592_v3 }
  0x1b   : > { %551 = vmatpush3.bf16.msra.mxu0 %v592_v3 }
  0x1c   : > { %552 = vmatprep.subr.bf16.mxu0 %v593_v4 }
  0x1f   : > { %553 = vmatpush3.bf16.msra.mxu0 %v593_v4 }
  0x20   : > { %554 = vmatprep.subr.bf16.mxu0 %v594_v5 }
  0x23   : > { %555 = vmatpush3.bf16.msra.mxu0 %v594_v5 }
  0x24   : > { %556 = vmatprep.subr.bf16.mxu0 %v595_v6 }
  0x27   : > { %557 = vmatpush3.bf16.msra.mxu0 %v595_v6 }
  0x28   : > { %558 = vmatprep.subr.bf16.mxu0 %v596_v7 }
  0x2b   : > { %559 = vmatpush3.bf16.msra.mxu0 %v596_v7 }
  0x2c   : > { %560 = vmatprep.subr.bf16.mxu0 %v597_v8 }
  0x2f   : > { %561 = vmatpush3.bf16.msra.mxu0 %v597_v8 }
  0x32   : > { %563 = vmatmul.mubr.bf16.vlgmr.msra.gmra.mrb[0].mxu0 %v599_v9 }
 0x105   : > { %v564_v10 = vpop.f32.mrb[0].mxu0 }
 0x106   : > { %v352_v12 = vpop.f32.mrb[1].mxu0  ;;  %v361_v14 = vadd.f32 %v564_v10, %v502_v11 }
 0x107   : > { %v565_v13 = vpop.f32.mrb[2].mxu0  ;;  %v353_v17 = vadd.f32 %v502_v11, %v352_v12 }
 0x108   : > { %v364_v15 = vadd.f32 %v565_v13, %v502_v11  ;;  %v355_v16 = vpop.f32.mrb[3].mxu0 }
 0x109   : > { %v356_v18 = vadd.f32 %v502_v11, %v355_v16 }
 0x10a   : > { %v533_v19 = vpack.c.bf16 %v364_v15, %v361_v14 }
 0x10b   : > { %v528_v20 = vpack.c.bf16 %v356_v18, %v353_v17 }
 0x10c   : > { %535 = vst [vmem:[%s228_s30 + $0x8] sm:$0xff] %v533_v19  }
 0x10d   : > { %529 = vst [vmem:[%s228_s30] sm:$0xff] %v528_v20  }
 0x10e PF: > { %s13_s14 = sadd.s32 1, %s622_s14   ;;  %s695_s12 = smov %s618_s13 }
 0x10f   : > { %p10_p5 = scmp.ge.s32.totalorder %s13_s14, 6   ;;  %s696_s13 = smov %s698_s15 }
 0x111   :  { %12 = sbr.rel (!%p10_p5) target bundleno = 2 (0x2), region = 68 }

</bundles_post_ra>
